<compile_context>
chip_gen: v5e
topology: v5e:2x2
jax: 0.10.0
libtpu: 0.0.40
codegen_flags: <defaults>
</compile_context>

<pallas_src>
import functools

import jax
import jax.numpy as jnp
from jax import lax
from jax.experimental import pallas as pl
from jax.experimental.pallas import tpu as pltpu


def _round_up(x, m):
    return (x + m - 1) // m * m


def _pick_tile(dim, candidates):
    """Largest MXU-friendly tile that evenly divides `dim`; otherwise the full
    extent (a full-extent block is always a legal BlockSpec)."""
    for c in candidates:
        if dim % c == 0:
            return c
    return dim


def linear_kernel(x_ref, w_ref, b_ref, o_ref, acc_ref):
    # x_ref:   [tm, tk]  activation tile
    # w_ref:   [tn, tk]  weight tile in PyTorch [noutput, input] layout
    # b_ref:   [1,  tn]  bias tile
    # o_ref:   [tm, tn]  output tile
    # acc_ref: [tm, tn]  f32 accumulator (persists across the K grid axis)
    k = pl.program_id(2)

    @pl.when(k == 0)
    def _():
        acc_ref[...] = jnp.zeros_like(acc_ref)

    # Contract last dim of x with last dim of w  ->  x @ W^T on the MXU,
    # no transpose materialized anywhere.
    acc_ref[...] += lax.dot_general(
        x_ref[...],
        w_ref[...],
        dimension_numbers=(((1,), (1,)), ((), ())),
        preferred_element_type=jnp.float32,
    )

    @pl.when(k == pl.num_programs(2) - 1)
    def _():
        # Bias add in f32 on the VPU (v5e has no bf16 VPU); single cast at store.
        o_ref[...] = (acc_ref[...] + b_ref[...].astype(jnp.float32)).astype(o_ref.dtype)


def prepare_params(weight, bias):
    """One-time (init-time) parameter preparation.

    Pads the output dimension up to a multiple of 128 so the kernel's output
    and bias tiles are lane-dense.  The weight stays in PyTorch
    [noutput, input_size] layout — no transpose is ever created.
    """
    n, k = weight.shape
    n_pad = _round_up(n, 128)
    w_p = jnp.pad(weight, ((0, n_pad - n), (0, 0)))          # [Np, K]
    b_p = jnp.pad(bias, (0, n_pad - n)).reshape(1, n_pad)    # [1, Np]
    return w_p, b_p


@functools.partial(jax.jit, static_argnames=("noutput",))
def dnn_onelayer_forward(x, w_padded, b_padded, noutput):
    """x: [B, K]; w_padded: [Np, K] (PyTorch layout, Np % 128 == 0);
    b_padded: [1, Np].  Returns [B, noutput]."""
    B, K = x.shape
    Np, K2 = w_padded.shape
    assert K == K2 and Np % 128 == 0 and b_padded.shape == (1, Np)

    # Tile selection: 256-wide tiles suit the v6e/v7x MXU, 128 suits v5e;
    # full-extent fallback keeps tiny/unaligned shapes legal.
    tm = _pick_tile(B, (256, 128, 8))
    tn = _pick_tile(Np, (256, 128))
    tk = _pick_tile(K, (512, 256, 128))
    grid = (B // tm, Np // tn, K // tk)

    out_padded = pl.pallas_call(
        linear_kernel,
        out_shape=jax.ShapeDtypeStruct((B, Np), x.dtype),
        grid=grid,
        in_specs=[
            pl.BlockSpec((tm, tk), lambda i, j, k: (i, k)),   # x
            pl.BlockSpec((tn, tk), lambda i, j, k: (j, k)),   # W (PyTorch layout)
            pl.BlockSpec((1, tn), lambda i, j, k: (0, j)),    # bias
        ],
        out_specs=pl.BlockSpec((tm, tn), lambda i, j, k: (i, j)),
        scratch_shapes=[pltpu.VMEM((tm, tn), jnp.float32)],
        compiler_params=pltpu.CompilerParams(
            dimension_semantics=("parallel", "parallel", "arbitrary"),
            # Small, explicit scoped-VMEM budget: safe on v7x's 64 MiB as well
            # as v5e/v6e's 128 MiB; our double-buffered tiles stay well below it.
            vmem_limit_bytes=32 * 1024 * 1024,
        ),
    )(x, w_padded, b_padded)

    # Drop the lane padding outside the kernel (cheap; keeps in-kernel stores
    # lane-dense).
    return out_padded[:, :noutput]


if __name__ == "__main__":
    # Module hyperparameters (hidden_size exists in the module signature but is
    # unused by its forward pass).
    batch = 8
    input_size = 32
    hidden_size = 64  # unused, kept for fidelity with the module signature
    noutput = 16

    key = jax.random.PRNGKey(0)
    kx, kw, kb = jax.random.split(key, 3)

    # Deterministic init mimicking nn.Linear default: U(-1/sqrt(fan_in), ...)
    bound = 1.0 / (input_size ** 0.5)
    weight = jax.random.uniform(kw, (noutput, input_size), jnp.float32,
                                minval=-bound, maxval=bound)
    bias = jax.random.uniform(kb, (noutput,), jnp.float32,
                              minval=-bound, maxval=bound)
    x = jax.random.normal(kx, (batch, input_size), jnp.float32)

    # One-time parameter prep (analogous to storing padded params at module
    # init) — nothing weight-shaped is re-materialized per forward call.
    w_p, b_p = prepare_params(weight, bias)

    out = dnn_onelayer_forward(x, w_p, b_p, noutput)
    out = jax.block_until_ready(out)

    # Cross-check against a plain-JAX reference of the PyTorch forward.
    ref = x @ weight.T + bias
    assert out.shape == (batch, noutput)
    assert jnp.allclose(out, ref, atol=1e-5, rtol=1e-5)

    print("KERNEL_OK")
</pallas_src>

<mosaic_0001>
module attributes {stable_mosaic.version = 11 : i64} {
  func.func @linear_kernel(%arg0: i32, %arg1: i32, %arg2: i32, %arg3: memref<8x32xf32, #tpu.memory_space<vmem>>, %arg4: memref<128x32xf32, #tpu.memory_space<vmem>>, %arg5: memref<1x128xf32, #tpu.memory_space<vmem>>, %arg6: memref<8x128xf32, #tpu.memory_space<vmem>>, %arg7: memref<8x128xf32, #tpu.memory_space<vmem>>) attributes {dimension_semantics = [#tpu.dimension_semantics<parallel>, #tpu.dimension_semantics<parallel>, #tpu.dimension_semantics<arbitrary>], iteration_bounds = array<i64: 1, 1, 1>, scalar_prefetch = 0 : i64, scratch_operands = 1 : i64, tpu.core_type = #tpu.core_type<tc>, window_params = [{transform_indices = @transform_0, window_bounds = array<i64: 8, 32>}, {transform_indices = @transform_1, window_bounds = array<i64: 128, 32>}, {transform_indices = @transform_2, window_bounds = array<i64: 1, 128>}, {transform_indices = @transform_3, window_bounds = array<i64: 8, 128>}]} {
    %c0_i32 = arith.constant 0 : i32
    %0 = arith.cmpi eq, %arg2, %c0_i32 : i32
    %1 = arith.extui %0 : i1 to i32
    %c0_i32_0 = arith.constant 0 : i32
    %2 = arith.cmpi ne, %1, %c0_i32_0 : i32
    scf.if %2 {
      %cst_10 = arith.constant 0.000000e+00 : f32
      %12 = vector.broadcast %cst_10 : f32 to vector<8x128xf32>
      %c0_11 = arith.constant 0 : index
      %c0_12 = arith.constant 0 : index
      %13 = vector.load %arg7[%c0_11, %c0_12] : memref<8x128xf32, #tpu.memory_space<vmem>>, vector<8x128xf32>
      tpu.vector_store %arg7[%c0_11, %c0_12], %12 {strides = array<i32>} : memref<8x128xf32, #tpu.memory_space<vmem>>, vector<8x128xf32>,
    } else {
    }
    %c0 = arith.constant 0 : index
    %c0_1 = arith.constant 0 : index
    %3 = vector.load %arg7[%c0, %c0_1] : memref<8x128xf32, #tpu.memory_space<vmem>>, vector<8x128xf32>
    %c0_2 = arith.constant 0 : index
    %c0_3 = arith.constant 0 : index
    %4 = vector.load %arg3[%c0_2, %c0_3] : memref<8x32xf32, #tpu.memory_space<vmem>>, vector<8x32xf32>
    %c0_4 = arith.constant 0 : index
    %c0_5 = arith.constant 0 : index
    %5 = vector.load %arg4[%c0_4, %c0_5] : memref<128x32xf32, #tpu.memory_space<vmem>>, vector<128x32xf32>
    %cst = arith.constant dense<0.000000e+00> : vector<8x128xf32>
    %6 = tpu.matmul %4, %5, %cst {dimension_numbers = #tpu.dot_dimension_numbers<[1], [1], [0], [0], [0, 0, 1, 0], [], []>} : vector<8x32xf32>, vector<128x32xf32>, vector<8x128xf32> -> vector<8x128xf32>
    %7 = arith.addf %3, %6 : vector<8x128xf32>
    %c0_6 = arith.constant 0 : index
    %c0_7 = arith.constant 0 : index
    %8 = vector.load %arg7[%c0_6, %c0_7] : memref<8x128xf32, #tpu.memory_space<vmem>>, vector<8x128xf32>
    tpu.vector_store %arg7[%c0_6, %c0_7], %7 {strides = array<i32>} : memref<8x128xf32, #tpu.memory_space<vmem>>, vector<8x128xf32>,
    %c0_i32_8 = arith.constant 0 : i32
    %9 = arith.cmpi eq, %arg2, %c0_i32_8 : i32
    %10 = arith.extui %9 : i1 to i32
    %c0_i32_9 = arith.constant 0 : i32
    %11 = arith.cmpi ne, %10, %c0_i32_9 : i32
    scf.if %11 {
      %c0_10 = arith.constant 0 : index
      %c0_11 = arith.constant 0 : index
      %12 = vector.load %arg7[%c0_10, %c0_11] : memref<8x128xf32, #tpu.memory_space<vmem>>, vector<8x128xf32>
      %c0_12 = arith.constant 0 : index
      %c0_13 = arith.constant 0 : index
      %13 = vector.load %arg5[%c0_12, %c0_13] : memref<1x128xf32, #tpu.memory_space<vmem>>, vector<1x128xf32>
      %14 = vector.broadcast %13 : vector<1x128xf32> to vector<8x128xf32>
      %15 = arith.addf %12, %14 : vector<8x128xf32>
      %c0_14 = arith.constant 0 : index
      %c0_15 = arith.constant 0 : index
      %16 = vector.load %arg6[%c0_14, %c0_15] : memref<8x128xf32, #tpu.memory_space<vmem>>, vector<8x128xf32>
      tpu.vector_store %arg6[%c0_14, %c0_15], %15 {strides = array<i32>} : memref<8x128xf32, #tpu.memory_space<vmem>>, vector<8x128xf32>,
    } else {
    }
    return
  }
  func.func @transform_0(%arg0: i32, %arg1: i32, %arg2: i32) -> (i32, i32) {
    %c0_i32 = arith.constant 0 : i32
    return %arg0, %arg2 : i32, i32
  }
  func.func @transform_1(%arg0: i32, %arg1: i32, %arg2: i32) -> (i32, i32) {
    %c0_i32 = arith.constant 0 : i32
    return %arg1, %arg2 : i32, i32
  }
  func.func @transform_2(%arg0: i32, %arg1: i32, %arg2: i32) -> (i32, i32) {
    %c0_i32 = arith.constant 0 : i32
    %c0_i32_0 = arith.constant 0 : i32
    return %c0_i32, %arg1 : i32, i32
  }
  func.func @transform_3(%arg0: i32, %arg1: i32, %arg2: i32) -> (i32, i32) {
    %c0_i32 = arith.constant 0 : i32
    return %arg0, %arg1 : i32, i32
  }
}

</mosaic_0001>

<bundles_post_ra>
// kernel: dnn_onelayer_forward.1
= control target key start
LH: loop header
LB: loop body
LE: loop exit
PB: predicated region body
PF: predicated region fallthrough
CT: control target
= control target key end

     0   :  { %vm38_vm0 = vcmask 261120   ;;  %s278_s0 = inlined_call_operand.vmem [shape: f32[8,32], index: 0, kind: input, shape index: {}]   ;;  %s279_s1 = inlined_call_operand.vmem [shape: f32[128,32], index: 1, kind: input, shape index: {}]   ;;  %s280_s2 = inlined_call_operand.vmem [shape: f32[1,128], index: 2, kind: input, shape index: {}]   ;;  %s281_s3 = inlined_call_operand.hbm [shape: f32[8,128], index: 3, kind: output, shape index: {}]  }
   0x1   :  { %v37_v0 = vld [vmem:[%s279_s1 + $0x78] sm:$0xff]  ;;  %v36_v1 = vld [vmem:[%s279_s1 + $0x70] sm:$0xff] }
   0x2   :  { %138 = vmatpush.xpose.msk.msra.mxu0 %vm38_vm0, %v37_v0 }
   0x3   :  { %8 = vsyncpa [#allocation4], 0  ;;  %v35_v2 = vld [vmem:[%s279_s1 + $0x68] sm:$0xff]  ;;  %v34_v3 = vld [vmem:[%s279_s1 + $0x60] sm:$0xff]  ;;  %s183_s21 = smov [#allocation3]   ;;  %s129_s25 = sshll.u32 %s281_s3, 4  ;;  %s130_s25 = int_to_ptr.hbm [resolvable:$true] %s129_s25 }
   0x4   :  { %v33_v4 = vld [vmem:[%s279_s1 + $0x58] sm:$0xff]  ;;  %v32_v5 = vld [vmem:[%s279_s1 + $0x50] sm:$0xff]  ;;  %v31_v6 = vld [vmem:[%s279_s1 + $0x48] sm:$0xff]  ;;  %s127_s22 = sshll.u32 %s183_s21, 4  ;;  %s128_s22 = int_to_ptr.vmem [resolvable:$true] %s127_s22 }
   0x5   :  { %v30_v7 = vld [vmem:[%s279_s1 + $0x40] sm:$0xff]  ;;  %v29_v8 = vld [vmem:[%s279_s1 + $0x38] sm:$0xff]  ;;  %v28_v9 = vld [vmem:[%s279_s1 + $0x30] sm:$0xff] }
   0x6   :  { %139 = vmatpush.xpose.msk.msra.mxu0 %vm38_vm0, %v36_v1  ;;  %v27_v10 = vld [vmem:[%s279_s1 + $0x28] sm:$0xff]  ;;  %v26_v11 = vld [vmem:[%s279_s1 + $0x20] sm:$0xff]  ;;  %v25_v12 = vld [vmem:[%s279_s1 + $0x18] sm:$0xff] }
   0x7   :  { %v24_v13 = vld [vmem:[%s279_s1 + $0x10] sm:$0xff]  ;;  %v23_v14 = vld [vmem:[%s279_s1 + $0x8] sm:$0xff]  ;;  %v22_v15 = vld [vmem:[%s279_s1] sm:$0xff] }
   0x8   :  { %v21_v16 = vld [vmem:[%s278_s0] sm:$0xff] }
   0x9   :  { %v156_v17 = vld [vmem:[%s280_s2] ss:$0 sm:$0xff] }
   0xa   :  { %140 = vmatpush.xpose.msk.msra.mxu0 %vm38_vm0, %v35_v2 }
   0xe   :  { %141 = vmatpush.xpose.msk.msra.mxu0 %vm38_vm0, %v34_v3 }
  0x12   :  { %142 = vmatpush.xpose.msk.msra.mxu0 %vm38_vm0, %v33_v4 }
  0x16   :  { %143 = vmatpush.xpose.msk.msra.mxu0 %vm38_vm0, %v32_v5 }
  0x1a   :  { %144 = vmatpush.xpose.msk.msra.mxu0 %vm38_vm0, %v31_v6 }
  0x1e   :  { %145 = vmatpush.xpose.msk.msra.mxu0 %vm38_vm0, %v30_v7 }
  0x22   :  { %146 = vmatpush.xpose.msk.msra.mxu0 %vm38_vm0, %v29_v8 }
  0x26   :  { %147 = vmatpush.xpose.msk.msra.mxu0 %vm38_vm0, %v28_v9 }
  0x2a   :  { %148 = vmatpush.xpose.msk.msra.mxu0 %vm38_vm0, %v27_v10 }
  0x2e   :  { %149 = vmatpush.xpose.msk.msra.mxu0 %vm38_vm0, %v26_v11 }
  0x32   :  { %150 = vmatpush.xpose.msk.msra.mxu0 %vm38_vm0, %v25_v12 }
  0x36   :  { %151 = vmatpush.xpose.msk.msra.mxu0 %vm38_vm0, %v24_v13 }
  0x3a   :  { %152 = vmatpush.xpose.msk.msra.mxu0 %vm38_vm0, %v23_v14 }
  0x3e   :  { %153 = vmatpush.xpose.msk.msra.mxu0 %vm38_vm0, %v22_v15 }
  0x41   :  { %154 = vmatmul.msk.f32.vlgmr.msra.gmra.mxu0 %vm38_vm0, %v21_v16 }
  0xbe   :  { %v107_v18 = vpop.f32.mrf.mxu0 }
  0xbf   :  { %v120_v19 = vadd.f32 %v156_v17, %v107_v18 }
  0xc1   :  { %121 = vst [vmem:[#allocation3] sm:$0xff] %v120_v19 }
  0xc2   :  { %132 = dma.vmem_to_hbm [thread:$0]  %s128_s22, 128, %s130_s25, [#allocation4]  }
  0xc3   :  { %181 = dma.done.wait [#allocation4], 128  }
  0xc4   :  { %182 = vsyncadd [#allocation4], 4294967168 }
  0xc5   :  { %137 = vsyncpa [#allocation4], 1 }

</bundles_post_ra>
